<compile_context>
chip_gen: v6e
topology: v6e:2x2x1
jax: 0.10.0
libtpu: 0.0.40
codegen_flags: <defaults>
</compile_context>

<pallas_src>
import functools

import jax
import jax.numpy as jnp
from jax import lax
from jax.experimental import pallas as pl
from jax.experimental.pallas import tpu as pltpu


# Per-row gather DMAs below this size are descriptor-issue bound, not
# bandwidth bound -> use the dense (XLA gather + BlockSpec) path instead.
_GATHER_ROW_BYTES_MIN = 512
# 1-D SMEM arrays pad to next_pow2(4N) bytes; keep the 3 scalar-prefetched id
# arrays comfortably inside SMEM, otherwise fall back to the dense path.
_GATHER_MAX_PREFETCH_IDS = 32768


def _round_up(x, m):
    return ((x + m - 1) // m) * m


def _choose_tile_b(batch, dim, itemsize):
    # 3 embedding streams, double-buffered.  Budget conservatively so the
    # same tiling is safe under v5e's 16 MiB scoped-VMEM default as well as
    # v6e/v7x; VMEM pads the lane dim to a multiple of 128.
    lane_dim = _round_up(max(dim, 1), 128)
    budget_bytes = 6 * 1024 * 1024
    tb = budget_bytes // (3 * 2 * lane_dim * itemsize)
    tb = max(8, min(int(tb), 2048))
    tb = (tb // 8) * 8
    return min(tb, _round_up(batch, 8))


# -----------------------------------------------------------------------------
# DENSE path: wrapper-side XLA gather + BlockSpec-pipelined reduction kernel.
# -----------------------------------------------------------------------------
def _bprmf_dense_kernel(ue_ref, ip_ref, ing_ref,       # (tile_b, D) VMEM blocks
                        sp_ref, sq_ref,                # (1, 1) SMEM outputs
                        acc,                           # (2,) SMEM scratch
                        *, batch_size, tile_b):
    t = pl.program_id(0)
    nt = pl.num_programs(0)

    @pl.when(t == 0)
    def _():
        acc[0] = 0.0
        acc[1] = 0.0

    ue = ue_ref[...].astype(jnp.float32)
    ip = ip_ref[...].astype(jnp.float32)
    ing = ing_ref[...].astype(jnp.float32)

    pos = jnp.sum(ue * ip, axis=1, keepdims=True)      # (tile_b, 1)
    neg = jnp.sum(ue * ing, axis=1, keepdims=True)
    x = pos - neg
    # -logsigmoid(x) == softplus(-x) = max(-x, 0) + log1p(exp(-|x|))
    softplus = jnp.maximum(-x, 0.0) + jnp.log1p(jnp.exp(-jnp.abs(x)))
    sq = 0.5 * jnp.sum(ue * ue + ip * ip + ing * ing, axis=1, keepdims=True)

    # Mask out padded rows of the (possibly ragged) last tile.
    row_ids = t * tile_b + lax.broadcasted_iota(jnp.int32, (tile_b, 1), 0)
    valid = row_ids < batch_size
    acc[0] += jnp.sum(jnp.where(valid, softplus, 0.0))
    acc[1] += jnp.sum(jnp.where(valid, sq, 0.0))

    @pl.when(t == nt - 1)
    def _():
        sp_ref[0, 0] = acc[0]
        sq_ref[0, 0] = acc[1]


def _dense_path(user_table, item_table, uid, pid, nid, *,
                tile_b, num_tiles, batch, batch_pad):
    dim = user_table.shape[1]
    dtype = user_table.dtype

    ue = jnp.take(user_table, uid, axis=0)
    ip = jnp.take(item_table, pid, axis=0)
    ing = jnp.take(item_table, nid, axis=0)
    if batch_pad > batch:
        pad = ((0, batch_pad - batch), (0, 0))
        ue = jnp.pad(ue, pad)
        ip = jnp.pad(ip, pad)
        ing = jnp.pad(ing, pad)

    kernel = functools.partial(_bprmf_dense_kernel,
                               batch_size=batch, tile_b=tile_b)
    block = pl.BlockSpec((tile_b, dim), lambda i: (i, 0))

    sp, sq = pl.pallas_call(
        kernel,
        out_shape=(jax.ShapeDtypeStruct((1, 1), jnp.float32),
                   jax.ShapeDtypeStruct((1, 1), jnp.float32)),
        grid_spec=pltpu.PrefetchScalarGridSpec(
            num_scalar_prefetch=0,
            grid=(num_tiles,),
            in_specs=[block, block, block],
            out_specs=(pl.BlockSpec(memory_space=pltpu.SMEM),
                       pl.BlockSpec(memory_space=pltpu.SMEM)),
            scratch_shapes=[pltpu.SMEM((2,), jnp.float32)]),
        compiler_params=pltpu.CompilerParams(
            dimension_semantics=("arbitrary",)),
        cost_estimate=pl.CostEstimate(
            flops=8 * batch_pad * dim,
            transcendentals=2 * batch_pad,
            bytes_accessed=3 * batch_pad * dim * dtype.itemsize),
    )(ue, ip, ing)
    return sp[0, 0], sq[0, 0]


# -----------------------------------------------------------------------------
# GATHER path: in-kernel double-buffered row-DMA gather (large rows only).
# -----------------------------------------------------------------------------
def _bprmf_gather_kernel(uid_ref, pid_ref, nid_ref,    # scalar prefetch (SMEM)
                         utab_ref, itab_ref,           # embedding tables (HBM)
                         sp_ref, sq_ref,               # (1, 1) SMEM outputs
                         ue_buf, ip_buf, ing_buf,      # (2, tile_b, D) VMEM
                         sems,                         # (2, 3) DMA semaphores
                         acc,                          # (2,) SMEM scratch
                         *, batch_size, tile_b):
    t = pl.program_id(0)
    nt = pl.num_programs(0)
    slot = t % 2

    def issue(tile_idx, dst_slot):
        base_row = tile_idx * tile_b          # hoisted out of the row loop

        def body(r, carry):
            row = base_row + r
            u = uid_ref[row]
            p = pid_ref[row]
            n = nid_ref[row]
            pltpu.make_async_copy(utab_ref.at[u], ue_buf.at[dst_slot, r],
                                  sems.at[dst_slot, 0]).start()
            pltpu.make_async_copy(itab_ref.at[p], ip_buf.at[dst_slot, r],
                                  sems.at[dst_slot, 1]).start()
            pltpu.make_async_copy(itab_ref.at[n], ing_buf.at[dst_slot, r],
                                  sems.at[dst_slot, 2]).start()
            return carry

        # Unrolled so scalar id loads / address math co-issue with the
        # descriptor pushes instead of serializing per row.
        lax.fori_loop(0, tile_b, body, 0, unroll=8)

    def wait(dst_slot):
        # One slab-sized wait per (slot, stream): DMA semaphores count bytes,
        # so a single descriptor covering the whole (tile_b, D) buffer drains
        # all tile_b per-row completion signals.  The src/dst refs only
        # supply the size; nothing is copied by a wait.
        pltpu.make_async_copy(ue_buf.at[dst_slot], ue_buf.at[dst_slot],
                              sems.at[dst_slot, 0]).wait()
        pltpu.make_async_copy(ip_buf.at[dst_slot], ip_buf.at[dst_slot],
                              sems.at[dst_slot, 1]).wait()
        pltpu.make_async_copy(ing_buf.at[dst_slot], ing_buf.at[dst_slot],
                              sems.at[dst_slot, 2]).wait()

    # Step 0: zero the scalar accumulators and prime the first gather slot.
    @pl.when(t == 0)
    def _():
        acc[0] = 0.0
        acc[1] = 0.0
        issue(0, 0)

    # Prefetch the next tile's rows into the other slot (overlaps this tile).
    @pl.when(t + 1 < nt)
    def _():
        issue(t + 1, 1 - slot)

    # Wait for this tile's gather, then compute on it.
    wait(slot)

    ue = ue_buf[slot].astype(jnp.float32)
    ip = ip_buf[slot].astype(jnp.float32)
    ing = ing_buf[slot].astype(jnp.float32)

    pos = jnp.sum(ue * ip, axis=1, keepdims=True)
    neg = jnp.sum(ue * ing, axis=1, keepdims=True)
    x = pos - neg
    softplus = jnp.maximum(-x, 0.0) + jnp.log1p(jnp.exp(-jnp.abs(x)))
    sq = 0.5 * jnp.sum(ue * ue + ip * ip + ing * ing, axis=1, keepdims=True)

    row_ids = t * tile_b + lax.broadcasted_iota(jnp.int32, (tile_b, 1), 0)
    valid = row_ids < batch_size
    acc[0] += jnp.sum(jnp.where(valid, softplus, 0.0))
    acc[1] += jnp.sum(jnp.where(valid, sq, 0.0))

    @pl.when(t == nt - 1)
    def _():
        sp_ref[0, 0] = acc[0]
        sq_ref[0, 0] = acc[1]


def _gather_path(user_table, item_table, uid, pid, nid, *,
                 tile_b, num_tiles, batch, batch_pad):
    dim = user_table.shape[1]
    dtype = user_table.dtype

    def pad_ids(ids):
        if batch_pad > batch:
            ids = jnp.concatenate(
                [ids, jnp.zeros((batch_pad - batch,), jnp.int32)])
        return ids

    uid, pid, nid = pad_ids(uid), pad_ids(pid), pad_ids(nid)

    kernel = functools.partial(_bprmf_gather_kernel,
                               batch_size=batch, tile_b=tile_b)

    grid_spec = pltpu.PrefetchScalarGridSpec(
        num_scalar_prefetch=3,
        grid=(num_tiles,),
        in_specs=[pl.BlockSpec(memory_space=pl.ANY),    # user table (HBM)
                  pl.BlockSpec(memory_space=pl.ANY)],   # item table (HBM)
        out_specs=(pl.BlockSpec(memory_space=pltpu.SMEM),
                   pl.BlockSpec(memory_space=pltpu.SMEM)),
        scratch_shapes=[
            pltpu.VMEM((2, tile_b, dim), dtype),        # user rows, 2 slots
            pltpu.VMEM((2, tile_b, dim), dtype),        # pos item rows
            pltpu.VMEM((2, tile_b, dim), dtype),        # neg item rows
            pltpu.SemaphoreType.DMA((2, 3)),            # per (slot, stream)
            pltpu.SMEM((2,), jnp.float32),              # scalar partial sums
        ])

    sp, sq = pl.pallas_call(
        kernel,
        out_shape=(jax.ShapeDtypeStruct((1, 1), jnp.float32),
                   jax.ShapeDtypeStruct((1, 1), jnp.float32)),
        grid_spec=grid_spec,
        compiler_params=pltpu.CompilerParams(
            dimension_semantics=("arbitrary",)),
        cost_estimate=pl.CostEstimate(
            flops=8 * batch_pad * dim,
            transcendentals=2 * batch_pad,
            bytes_accessed=(3 * batch * dim * dtype.itemsize
                            + 3 * batch_pad * 4)),
    )(uid, pid, nid, user_table, item_table)
    return sp[0, 0], sq[0, 0]


# -----------------------------------------------------------------------------
# Public entry point (matches BPRMF.forward semantics).
# -----------------------------------------------------------------------------
def bprmf_forward(user_table, item_table, userids, itemids_pos, itemids_neg,
                  reg_learning_rate, *, tile_b=None, use_gather=None):
    """Fused BPRMF loss.  Returns (base_loss, reg_loss) as BPRMF._compute_loss."""
    _, dim = user_table.shape
    batch = int(userids.shape[0])
    itemsize = jnp.dtype(user_table.dtype).itemsize

    if tile_b is None:
        tile_b = _choose_tile_b(batch, dim, itemsize)
    num_tiles = -(-batch // tile_b)
    batch_pad = num_tiles * tile_b

    uid = userids.astype(jnp.int32)
    pid = itemids_pos.astype(jnp.int32)
    nid = itemids_neg.astype(jnp.int32)

    if use_gather is None:
        use_gather = (dim * itemsize >= _GATHER_ROW_BYTES_MIN
                      and batch_pad <= _GATHER_MAX_PREFETCH_IDS)

    path = _gather_path if use_gather else _dense_path
    sp_sum, sq_sum = path(user_table, item_table, uid, pid, nid,
                          tile_b=tile_b, num_tiles=num_tiles,
                          batch=batch, batch_pad=batch_pad)

    base_loss = sp_sum / batch
    reg_loss = reg_learning_rate * sq_sum
    return base_loss, reg_loss


# -----------------------------------------------------------------------------
# Reference & test harness.
# -----------------------------------------------------------------------------
def _xavier_uniform(key, shape, gain):
    # nn.init.xavier_uniform_ with gain=calculate_gain('relu')=sqrt(2)
    fan_out, fan_in = shape
    bound = gain * jnp.sqrt(6.0 / (fan_in + fan_out))
    return jax.random.uniform(key, shape, jnp.float32, -bound, bound)


def _reference(user_table, item_table, userids, ipos, ineg, reg_lr):
    ue = user_table[userids]
    ip = item_table[ipos]
    ing = item_table[ineg]
    pos = jnp.sum(ue * ip, axis=1)
    neg = jnp.sum(ue * ing, axis=1)
    base = jnp.mean(-jax.nn.log_sigmoid(pos - neg))
    l2 = lambda e: jnp.sum(jnp.sum(e ** 2, axis=1) / 2.0)
    reg = reg_lr * (l2(ue) + l2(ip) + l2(ing))
    return base, reg


if __name__ == "__main__":
    key = jax.random.PRNGKey(0)
    keys = jax.random.split(key, 10)
    gain = float(jnp.sqrt(2.0))   # nn.init.calculate_gain('relu')
    reg_lr = 1e-3

    # ---- Dense (small-D) path: D=32 -> wrapper XLA gather + BlockSpec kernel.
    n_users, n_items, dim = 64, 128, 32
    user_table = _xavier_uniform(keys[0], (n_users, dim), gain)
    item_table = _xavier_uniform(keys[1], (n_items, dim), gain)

    batch = 8
    uids = jax.random.randint(keys[2], (batch,), 0, n_users, jnp.int32)
    pids = jax.random.randint(keys[3], (batch,), 0, n_items, jnp.int32)
    nids = jax.random.randint(keys[4], (batch,), 0, n_items, jnp.int32)

    base1, reg1 = bprmf_forward(user_table, item_table, uids, pids, nids,
                                reg_lr)
    jax.block_until_ready((base1, reg1))
    rbase1, rreg1 = _reference(user_table, item_table, uids, pids, nids,
                               reg_lr)
    assert jnp.allclose(base1, rbase1, rtol=1e-5, atol=1e-6), (base1, rbase1)
    assert jnp.allclose(reg1, rreg1, rtol=1e-5, atol=1e-6), (reg1, rreg1)

    # ---- Multi-tile dense path with a ragged last tile (padded-row masking).
    batch2 = 25
    uids2 = jax.random.randint(keys[5], (batch2,), 0, n_users, jnp.int32)
    pids2 = jax.random.randint(keys[6], (batch2,), 0, n_items, jnp.int32)
    nids2 = jax.random.randint(keys[7], (batch2,), 0, n_items, jnp.int32)

    base2, reg2 = bprmf_forward(user_table, item_table, uids2, pids2, nids2,
                                reg_lr, tile_b=8)
    jax.block_until_ready((base2, reg2))
    rbase2, rreg2 = _reference(user_table, item_table, uids2, pids2, nids2,
                               reg_lr)
    assert jnp.allclose(base2, rbase2, rtol=1e-5, atol=1e-6), (base2, rbase2)
    assert jnp.allclose(reg2, rreg2, rtol=1e-5, atol=1e-6), (reg2, rreg2)

    # ---- In-kernel gather path: D=128 f32 = 512 B/row (>= threshold),
    # multi-tile + ragged last tile -> exercises the double-buffered gather,
    # the coalesced slab waits and the unrolled issue loop.
    dim_g = 128
    user_table_g = _xavier_uniform(keys[8], (n_users, dim_g), gain)
    item_table_g = _xavier_uniform(keys[9], (n_items, dim_g), gain)

    batch3 = 20
    uids3 = jax.random.randint(keys[2], (batch3,), 0, n_users, jnp.int32)
    pids3 = jax.random.randint(keys[3], (batch3,), 0, n_items, jnp.int32)
    nids3 = jax.random.randint(keys[4], (batch3,), 0, n_items, jnp.int32)

    base3, reg3 = bprmf_forward(user_table_g, item_table_g, uids3, pids3,
                                nids3, reg_lr, tile_b=8)
    jax.block_until_ready((base3, reg3))
    rbase3, rreg3 = _reference(user_table_g, item_table_g, uids3, pids3,
                               nids3, reg_lr)
    assert jnp.allclose(base3, rbase3, rtol=1e-5, atol=1e-6), (base3, rbase3)
    assert jnp.allclose(reg3, rreg3, rtol=1e-5, atol=1e-6), (reg3, rreg3)

    print("KERNEL_OK")
</pallas_src>

<mosaic_0001>
module attributes {stable_mosaic.version = 11 : i64} {
  func.func @_bprmf_dense_kernel(%arg0: i32, %arg1: memref<8x32xf32, #tpu.memory_space<vmem>>, %arg2: memref<8x32xf32, #tpu.memory_space<vmem>>, %arg3: memref<8x32xf32, #tpu.memory_space<vmem>>, %arg4: memref<1x1xf32, #tpu.memory_space<smem>>, %arg5: memref<1x1xf32, #tpu.memory_space<smem>>, %arg6: memref<2xf32, #tpu.memory_space<smem>>) attributes {dimension_semantics = [#tpu.dimension_semantics<arbitrary>], iteration_bounds = array<i64: 1>, scalar_prefetch = 0 : i64, scratch_operands = 1 : i64, tpu.core_type = #tpu.core_type<tc>, window_params = [{transform_indices = @transform_0, window_bounds = array<i64: 8, 32>}, {transform_indices = @transform_1, window_bounds = array<i64: 8, 32>}, {transform_indices = @transform_2, window_bounds = array<i64: 8, 32>}, {transform_indices = @transform_3, window_bounds = array<i64: 1, 1>}, {transform_indices = @transform_4, window_bounds = array<i64: 1, 1>}]} {
    %c0_i32 = arith.constant 0 : i32
    %0 = arith.cmpi eq, %arg0, %c0_i32 : i32
    %1 = arith.extui %0 : i1 to i32
    %c0_i32_0 = arith.constant 0 : i32
    %2 = arith.cmpi ne, %1, %c0_i32_0 : i32
    scf.if %2 {
      %cst_22 = arith.constant 0.000000e+00 : f32
      %c0_23 = arith.constant 0 : index
      %59 = memref.load %arg6[%c0_23] : memref<2xf32, #tpu.memory_space<smem>>
      memref.store %cst_22, %arg6[%c0_23] : memref<2xf32, #tpu.memory_space<smem>>
      %cst_24 = arith.constant 0.000000e+00 : f32
      %c1_25 = arith.constant 1 : index
      %60 = memref.load %arg6[%c1_25] : memref<2xf32, #tpu.memory_space<smem>>
      memref.store %cst_24, %arg6[%c1_25] : memref<2xf32, #tpu.memory_space<smem>>
    } else {
    }
    %c0 = arith.constant 0 : index
    %c0_1 = arith.constant 0 : index
    %3 = vector.load %arg1[%c0, %c0_1] : memref<8x32xf32, #tpu.memory_space<vmem>>, vector<8x32xf32>
    %c0_2 = arith.constant 0 : index
    %c0_3 = arith.constant 0 : index
    %4 = vector.load %arg2[%c0_2, %c0_3] : memref<8x32xf32, #tpu.memory_space<vmem>>, vector<8x32xf32>
    %c0_4 = arith.constant 0 : index
    %c0_5 = arith.constant 0 : index
    %5 = vector.load %arg3[%c0_4, %c0_5] : memref<8x32xf32, #tpu.memory_space<vmem>>, vector<8x32xf32>
    %6 = arith.mulf %3, %4 : vector<8x32xf32>
    %cst = arith.constant dense<0.000000e+00> : vector<8xf32>
    %7 = vector.multi_reduction <add>, %6, %cst [1] : vector<8x32xf32> to vector<8xf32>
    %8 = vector.shape_cast %7 : vector<8xf32> to vector<8x1xf32>
    %9 = arith.mulf %3, %5 : vector<8x32xf32>
    %cst_6 = arith.constant dense<0.000000e+00> : vector<8xf32>
    %10 = vector.multi_reduction <add>, %9, %cst_6 [1] : vector<8x32xf32> to vector<8xf32>
    %11 = vector.shape_cast %10 : vector<8xf32> to vector<8x1xf32>
    %12 = arith.subf %8, %11 : vector<8x1xf32>
    %cst_7 = arith.constant 0.000000e+00 : f32
    %13 = vector.broadcast %cst_7 : f32 to vector<8x1xf32>
    %14 = arith.subf %13, %12 : vector<8x1xf32>
    %cst_8 = arith.constant 0.000000e+00 : f32
    %15 = vector.broadcast %cst_8 : f32 to vector<8x1xf32>
    %16 = arith.maximumf %14, %15 : vector<8x1xf32>
    %17 = math.absf %12 : vector<8x1xf32>
    %cst_9 = arith.constant 0.000000e+00 : f32
    %18 = vector.broadcast %cst_9 : f32 to vector<8x1xf32>
    %19 = arith.subf %18, %17 : vector<8x1xf32>
    %20 = math.exp %19 : vector<8x1xf32>
    %21 = math.log1p %20 : vector<8x1xf32>
    %22 = arith.addf %16, %21 : vector<8x1xf32>
    %23 = arith.mulf %3, %3 : vector<8x32xf32>
    %24 = arith.mulf %4, %4 : vector<8x32xf32>
    %25 = arith.addf %23, %24 : vector<8x32xf32>
    %26 = arith.mulf %5, %5 : vector<8x32xf32>
    %27 = arith.addf %25, %26 : vector<8x32xf32>
    %cst_10 = arith.constant dense<0.000000e+00> : vector<8xf32>
    %28 = vector.multi_reduction <add>, %27, %cst_10 [1] : vector<8x32xf32> to vector<8xf32>
    %29 = vector.shape_cast %28 : vector<8xf32> to vector<8x1xf32>
    %cst_11 = arith.constant 5.000000e-01 : f32
    %30 = vector.broadcast %cst_11 : f32 to vector<8x1xf32>
    %31 = arith.mulf %30, %29 : vector<8x1xf32>
    %c8_i32 = arith.constant 8 : i32
    %32 = arith.muli %arg0, %c8_i32 : i32
    %33 = tpu.iota {dimensions = array<i32: 0>} : vector<8x1xi32>
    %34 = vector.broadcast %32 : i32 to vector<8x1xi32>
    %35 = arith.addi %34, %33 : vector<8x1xi32>
    %c8_i32_12 = arith.constant 8 : i32
    %36 = vector.broadcast %c8_i32_12 : i32 to vector<8x1xi32>
    %37 = arith.cmpi slt, %35, %36 : vector<8x1xi32>
    %c0_13 = arith.constant 0 : index
    %38 = memref.load %arg6[%c0_13] : memref<2xf32, #tpu.memory_space<smem>>
    %cst_14 = arith.constant 0.000000e+00 : f32
    %39 = vector.broadcast %cst_14 : f32 to vector<8x1xf32>
    %40 = arith.select %37, %22, %39 : vector<8x1xi1>, vector<8x1xf32>
    %41 = vector.shape_cast %40 : vector<8x1xf32> to vector<1x8x1xf32>
    %cst_15 = arith.constant dense<0.000000e+00> : vector<1xf32>
    %42 = vector.multi_reduction <add>, %41, %cst_15 [1, 2] : vector<1x8x1xf32> to vector<1xf32>
    %43 = vector.shape_cast %42 : vector<1xf32> to vector<1x1x1xf32>
    %44 = vector.extract %43[0, 0, 0] : f32 from vector<1x1x1xf32>
    %45 = arith.addf %38, %44 : f32
    %c0_16 = arith.constant 0 : index
    %46 = memref.load %arg6[%c0_16] : memref<2xf32, #tpu.memory_space<smem>>
    memref.store %45, %arg6[%c0_16] : memref<2xf32, #tpu.memory_space<smem>>
    %c1 = arith.constant 1 : index
    %47 = memref.load %arg6[%c1] : memref<2xf32, #tpu.memory_space<smem>>
    %cst_17 = arith.constant 0.000000e+00 : f32
    %48 = vector.broadcast %cst_17 : f32 to vector<8x1xf32>
    %49 = arith.select %37, %31, %48 : vector<8x1xi1>, vector<8x1xf32>
    %50 = vector.shape_cast %49 : vector<8x1xf32> to vector<1x8x1xf32>
    %cst_18 = arith.constant dense<0.000000e+00> : vector<1xf32>
    %51 = vector.multi_reduction <add>, %50, %cst_18 [1, 2] : vector<1x8x1xf32> to vector<1xf32>
    %52 = vector.shape_cast %51 : vector<1xf32> to vector<1x1x1xf32>
    %53 = vector.extract %52[0, 0, 0] : f32 from vector<1x1x1xf32>
    %54 = arith.addf %47, %53 : f32
    %c1_19 = arith.constant 1 : index
    %55 = memref.load %arg6[%c1_19] : memref<2xf32, #tpu.memory_space<smem>>
    memref.store %54, %arg6[%c1_19] : memref<2xf32, #tpu.memory_space<smem>>
    %c0_i32_20 = arith.constant 0 : i32
    %56 = arith.cmpi eq, %arg0, %c0_i32_20 : i32
    %57 = arith.extui %56 : i1 to i32
    %c0_i32_21 = arith.constant 0 : i32
    %58 = arith.cmpi ne, %57, %c0_i32_21 : i32
    scf.if %58 {
      %c0_22 = arith.constant 0 : index
      %59 = memref.load %arg6[%c0_22] : memref<2xf32, #tpu.memory_space<smem>>
      %c0_23 = arith.constant 0 : index
      %c0_24 = arith.constant 0 : index
      %60 = memref.load %arg4[%c0_23, %c0_24] : memref<1x1xf32, #tpu.memory_space<smem>>
      memref.store %59, %arg4[%c0_23, %c0_24] : memref<1x1xf32, #tpu.memory_space<smem>>
      %c1_25 = arith.constant 1 : index
      %61 = memref.load %arg6[%c1_25] : memref<2xf32, #tpu.memory_space<smem>>
      %c0_26 = arith.constant 0 : index
      %c0_27 = arith.constant 0 : index
      %62 = memref.load %arg5[%c0_26, %c0_27] : memref<1x1xf32, #tpu.memory_space<smem>>
      memref.store %61, %arg5[%c0_26, %c0_27] : memref<1x1xf32, #tpu.memory_space<smem>>
    } else {
    }
    return
  }
  func.func @transform_0(%arg0: i32) -> (i32, i32) {
    %c0_i32 = arith.constant 0 : i32
    %c0_i32_0 = arith.constant 0 : i32
    return %arg0, %c0_i32 : i32, i32
  }
  func.func @transform_1(%arg0: i32) -> (i32, i32) {
    %c0_i32 = arith.constant 0 : i32
    %c0_i32_0 = arith.constant 0 : i32
    return %arg0, %c0_i32 : i32, i32
  }
  func.func @transform_2(%arg0: i32) -> (i32, i32) {
    %c0_i32 = arith.constant 0 : i32
    %c0_i32_0 = arith.constant 0 : i32
    return %arg0, %c0_i32 : i32, i32
  }
  func.func @transform_3(%arg0: i32) -> (i32, i32) {
    %c0_i32 = arith.constant 0 : i32
    %c0_i32_0 = arith.constant 0 : i32
    %c0_i32_1 = arith.constant 0 : i32
    return %c0_i32, %c0_i32_0 : i32, i32
  }
  func.func @transform_4(%arg0: i32) -> (i32, i32) {
    %c0_i32 = arith.constant 0 : i32
    %c0_i32_0 = arith.constant 0 : i32
    %c0_i32_1 = arith.constant 0 : i32
    return %c0_i32, %c0_i32_0 : i32, i32
  }
}

</mosaic_0001>

<bundles_post_ra>
// kernel: tpu_custom_call.1
= control target key start
LH: loop header
LB: loop body
LE: loop exit
PB: predicated region body
PF: predicated region fallthrough
CT: control target
= control target key end

     0   :  { %10 = vsyncpa [#allocation4], 0  ;;  %s318_s0 = inlined_call_operand.hbm [shape: f32[8,32], index: 0, kind: input, shape index: {}]   ;;  %s319_s1 = inlined_call_operand.hbm [shape: f32[8,32], index: 1, kind: input, shape index: {}]   ;;  %s320_s2 = inlined_call_operand.hbm [shape: f32[8,32], index: 2, kind: input, shape index: {}]   ;;  %s321_s3 = inlined_call_operand.hbm [shape: f32[1,1], index: 3, kind: output, shape index: {0}]   ;;  %s322_s4 = inlined_call_operand.hbm [shape: f32[1,1], index: 4, kind: output, shape index: {1}]  }
   0x1   :  { %11 = vsyncpa [#allocation7], 0 }
   0x2   :  { %12 = vsyncpa [#allocation5], 0 }
   0x3   :  { %13 = vsyncpa [#allocation11], 0  ;;  %s271_s15 = smov [#allocation6]   ;;  %s272_s17 = smov [#allocation3]  }
   0x4   :  { %s30_s16 = sshll.u32 %s271_s15, 4  ;;  %s20_s18 = sshll.u32 %s272_s17, 4  ;;  %s31_s16 = int_to_ptr.vmem [resolvable:$true] %s30_s16  ;;  %s21_s18 = int_to_ptr.vmem [resolvable:$true] %s20_s18 }
   0x5   :  { %s195_s19 = scalar_lea.vmem %s31_s16, 128  ;;  %p200_p1 = scmp.lt.s32.totalorder %s31_s16, %s31_s16 }
   0x6   :  { %p196_p0 = scmp.ne.s32.totalorder %s31_s16, %s195_s19  ;;  %p201_p2 = scmp.lt.s32.totalorder %s195_s19, %s195_s19 }
   0x8   :  { %p202_p3 = por %p201_p2, %p200_p1 }
   0xa   :  { %p203_p4 = pnand %p202_p3, %p196_p0 }
   0xc   :  { %206 = shalt.err (!%p203_p4)
}
   0xd   :  { %33 = dma.hbm_to_vmem [thread:$0]  %s319_s1, 128, %s31_s16, [#allocation7]  }
   0xe   :  { %s215_s22 = scalar_lea.vmem %s21_s18, 128  ;;  %p220_p6 = scmp.lt.s32.totalorder %s21_s18, %s21_s18 }
   0xf   :  { %p216_p5 = scmp.ne.s32.totalorder %s21_s18, %s215_s22  ;;  %p221_p7 = scmp.lt.s32.totalorder %s215_s22, %s215_s22 }
  0x11   :  { %p222_p8 = por %p221_p7, %p220_p6 }
  0x13   :  { %p223_p9 = pnand %p222_p8, %p216_p5 }
  0x15   :  { %226 = shalt.err (!%p223_p9)
}
  0x16   :  { %23 = dma.hbm_to_vmem [thread:$0]  %s318_s0, 128, %s21_s18, [#allocation4]  }
  0x17   :  { %s273_s25 = smov [#allocation8]  }
  0x18   :  { %s40_s26 = sshll.u32 %s273_s25, 4  ;;  %s41_s26 = int_to_ptr.vmem [resolvable:$true] %s40_s26 }
  0x19   :  { %s235_s27 = scalar_lea.vmem %s41_s26, 128  ;;  %p240_p11 = scmp.lt.s32.totalorder %s41_s26, %s41_s26 }
  0x1a   :  { %p236_p10 = scmp.ne.s32.totalorder %s41_s26, %s235_s27  ;;  %p241_p12 = scmp.lt.s32.totalorder %s235_s27, %s235_s27 }
  0x1c   :  { %p242_p13 = por %p241_p12, %p240_p11 }
  0x1e   :  { %p243_p0 = pnand %p242_p13, %p236_p10 }
  0x20   :  { %246 = shalt.err (!%p243_p0)
}
  0x21   :  { %43 = dma.hbm_to_vmem [thread:$0]  %s320_s2, 128, %s41_s26, [#allocation7]  }
  0x22   :  { %263 = dma.done.wait [#allocation4], 128  }
  0x23   :  { %264 = vsyncadd [#allocation4], 4294967168 }
  0x24   :  { %265 = dma.done.wait [#allocation7], 256  }
  0x25   :  { %266 = vsyncadd [#allocation7], 4294967040  ;;  %v61_v0 = vld [vmem:[#allocation3] sm:$0xff]  ;;  %v62_v1 = vld [vmem:[#allocation6] sm:$0xff]  ;;  %vm65_vm0 = vcmask 261120   ;;  %vm107_vm1 = vcmask 7168  }
  0x26   :  { %v63_v2 = vld [vmem:[#allocation8] sm:$0xff]  ;;  %v64_v3 = vmul.f32 %v62_v1, %v61_v0  ;;  %v91_v4 = vmul.f32 %v62_v1, %v62_v1  ;;  %v90_v6 = vmul.f32 %v61_v0, %v61_v0  ;;  %s274_s29 = smov [#allocation9]   ;;  %s275_s6 = smov [#allocation10]  }
  0x27   :  { %v69_v5 = vmul.f32 %v63_v2, %v61_v0  ;;  %v93_v7 = vmul.f32 %v63_v2, %v63_v2 }
  0x28   :  { %v66_v8 = vsel %vm65_vm0, %v64_v3, 0.0  ;;  %v92_v9 = vadd.f32 %v91_v4, %v90_v6 }
  0x29   :  { %67 = vadd.xlane.f32.xlu0 %v66_v8  ;;  %v70_v10 = vsel %vm65_vm0, %v69_v5, 0.0 }
  0x2a   :  { %v94_v11 = vadd.f32 %v93_v7, %v92_v9 }
  0x2c   :  { %v95_v12 = vsel %vm65_vm0, %v94_v11, 0.0 }
  0x2d   :  { %71 = vadd.xlane.f32.xlu0 %v70_v10  ;;  %96 = vadd.xlane.f32.xlu1 %v95_v12 }
  0xb2   :  { %v68_v13 = vpop.xlane.xlu0 %67 }
  0xb6   :  { %v72_v14 = vpop.xlane.xlu0 %71  ;;  %v97_v15 = vpop.xlane.xlu1 %96 }
  0xb7   :  { %v73_v16 = vsub.f32 %v68_v13, %v72_v14  ;;  %v98_v17 = vmul.f32 0.5, %v97_v15 }
  0xb9   :  { %v76_v18 = vand.u32 2147483647, %v73_v16  ;;  %v123_v19 = vsel %vm107_vm1, %v98_v17, 0.0  ;;  %v74_v26 = vsub.f32 0.0, %v73_v16 }
  0xba   :  { %124 = vadd.xlane.f32.xlu0 %v123_v19 }
  0xbb   :  { %v77_v20 = vsub.f32 0.0, %v76_v18  ;;  %v75_v31 = vmax.f32 %v74_v26, 0.0 }
  0xbd   :  { %v78_v21 = vmul.f32 1.442695, %v77_v20 }
  0xbf   :  { %183 = vpow2.f32 %v78_v21 }
  0xcc   :  { %v184_v22 = vpop.eup %183 }
  0xcd   :  { %v80_v23 = vadd.f32 1.0, %v184_v22  ;;  %v83_v24 = vmul.f32 -0.5, %v184_v22  ;;  %v86_v27 = vand.u32 2147483647, %v184_v22 }
  0xcf   :  { %185 = vlog2.f32 %v80_v23  ;;  %v84_v25 = vadd.f32 1.0, %v83_v24  ;;  %vm87_vm2 = vcmp.lt.f32.partialorder %v86_v27, 0.0004427343 }
  0xd1   :  { %v85_v30 = vmul.f32 %v184_v22, %v84_v25 }
  0xdc   :  { %v186_v28 = vpop.eup %185 }
  0xdd   :  { %v82_v29 = vmul.f32 0.6931472, %v186_v28 }
  0xdf   :  { %v88_v32 = vsel %vm87_vm2, %v85_v30, %v82_v29 }
  0xe0   :  { %v89_v33 = vadd.f32 %v88_v32, %v75_v31 }
  0xe2   :  { %v108_v34 = vsel %vm107_vm1, %v89_v33, 0.0 }
  0xe3   :  { %109 = vadd.xlane.f32.xlu1 %v108_v34 }
 0x143   :  { %v125_v35 = vpop.xlane.xlu0 %124 }
 0x144   :  { %v126_v36 = vrot.slane %v125_v35, 4 }
 0x146   :  { %v127_v37 = vadd.f32 %v126_v36, %v125_v35 }
 0x148   :  { %v128_v38 = vrot.slane %v127_v37, 2 }
 0x14a   :  { %v129_v42 = vadd.f32 %v128_v38, %v127_v37 }
 0x14c   :  { %v130_v45 = vrot.slane %v129_v42, 1 }
 0x14e   :  { %v131_v48 = vadd.f32 %v130_v45, %v129_v42 }
 0x16c   :  { %v110_v39 = vpop.xlane.xlu1 %109 }
 0x16d   :  { %v111_v40 = vrot.slane %v110_v39, 4 }
 0x16f   :  { %v112_v41 = vadd.f32 %v111_v40, %v110_v39 }
 0x171   :  { %v113_v43 = vrot.slane %v112_v41, 2 }
 0x173   :  { %v114_v44 = vadd.f32 %v113_v43, %v112_v41 }
 0x175   :  { %v115_v46 = vrot.slane %v114_v44, 1 }
 0x177   :  { %v116_v47 = vadd.f32 %v115_v46, %v114_v44 }
 0x179   :  { %174 = vpush %v116_v47 }
 0x17a   :  { %176 = vpush %v131_v48 }
 0x1aa   :  { %s175_s0 = spop %174 }
 0x1ab   :  { %141 = sst [smem:[#allocation9]] %s175_s0  ;;  %s177_s2 = spop %176 }
 0x1ac   :  { %144 = sst [smem:[#allocation10]] %s177_s2 }
 0x1ad   :  { %152 = dma.smem_to_hbm %s274_s29, 16, %s321_s3, [#allocation5]  }
 0x1ae   :  { %160 = dma.smem_to_hbm %s275_s6, 16, %s322_s4, [#allocation11]  }
 0x1af   :  { %267 = dma.done.wait [#allocation5], 16  }
 0x1b0   :  { %268 = vsyncadd [#allocation5], 4294967280 }
 0x1b1   :  { %269 = dma.done.wait [#allocation11], 16  }
 0x1b2   :  { %270 = vsyncadd [#allocation11], 4294967280 }
 0x1b3   :  { %167 = sfence }
 0x1b4   :  { %168 = vsyncpa [#allocation4], 1 }
 0x1b5   :  { %169 = vsyncpa [#allocation7], 1 }
 0x1b6   :  { %170 = vsyncpa [#allocation5], 1 }
 0x1b7   :  { %171 = vsyncpa [#allocation11], 1 }

</bundles_post_ra>
